<compile_context>
chip_gen: v7x
topology: tpu7x:2x2x1
jax: 0.10.0
libtpu: 0.0.40
codegen_flags: <defaults>
</compile_context>

<pallas_src>
import jax
import jax.numpy as jnp
from jax.experimental import pallas as pl
from jax.experimental.pallas import tpu as pltpu

INPUT_SIZE = 521
HIDDEN_SIZES = [256, 128, 64]
OUTPUT_SIZE = 12

# Lane-padded sizes (multiples of 128 -> unmasked MXU operand tiles).
IN_PAD = 640          # 521 -> 640  (5 * 128)
H1, H2 = 256, 128     # already lane-aligned
H3_PAD = 128          # 64  -> 128
OUT_PAD = 128         # 12  -> 128 (weight/bias padding only; HBM out is 12)


def _round_up(n, m):
    return (n + m - 1) // m * m


def mlp_kernel(x_ref,
               w1_ref, b1_ref,
               w2_ref, b2_ref,
               w3_ref, b3_ref,
               w4_ref, b4_ref,
               o_ref,
               xpad_ref):
    """One batch tile of the fused MLP; all weights resident in VMEM.

    Dots run on the MXU with bf16 inputs and f32 accumulation; bias-add and
    ReLU are done in f32 on the VPU.  x arrives as the raw f32 (tb, 521) tile
    and is cast + zero-padded to 640 lanes in VMEM scratch here (explicit
    zeros: W1 rows 521..639 are zero, but a garbage NaN lane would still
    contaminate real outputs via NaN * 0, so never rely on unspecified pad)."""
    wdt = w1_ref.dtype

    xpad_ref[:, :INPUT_SIZE] = x_ref[...].astype(wdt)
    xpad_ref[:, INPUT_SIZE:] = jnp.zeros(
        (xpad_ref.shape[0], IN_PAD - INPUT_SIZE), dtype=wdt)

    h = jnp.dot(xpad_ref[...], w1_ref[...], preferred_element_type=jnp.float32)
    h = jnp.maximum(h + b1_ref[...], 0.0)

    h = jnp.dot(h.astype(wdt), w2_ref[...], preferred_element_type=jnp.float32)
    h = jnp.maximum(h + b2_ref[...], 0.0)

    h = jnp.dot(h.astype(wdt), w3_ref[...], preferred_element_type=jnp.float32)
    h = jnp.maximum(h + b3_ref[...], 0.0)

    h = jnp.dot(h.astype(wdt), w4_ref[...], preferred_element_type=jnp.float32)
    h = h + b4_ref[...]

    # Only the first OUTPUT_SIZE lanes are real; store them directly so the
    # HBM writeback is 12 f32/row instead of 128 (+ no wrapper post-slice).
    o_ref[...] = h[:, :OUTPUT_SIZE].astype(o_ref.dtype)


def net_mlp_forward(x, params, *, block_b=1024):
    """x: (B, INPUT_SIZE) float32.  params: padded params from init_params.

    Returns (B, OUTPUT_SIZE) float32, matching NetMLP.forward."""
    B = x.shape[0]
    wdt = params["w1"].dtype

    # Sublane-aligned tile.  Aim for >= 2 grid steps when the batch allows so
    # v7x's two TensorCores both get work on the "parallel" batch axis, while
    # capping the tile at block_b to bound VMEM.
    block_b = max(8, _round_up(block_b, 8))
    tb = min(block_b, max(8, _round_up(pl.cdiv(B, 2), 8)))
    grid = (pl.cdiv(B, tb),)

    def _resident(shape):
        # Same block every grid step -> weight/bias stays resident in VMEM.
        return pl.BlockSpec(shape, lambda i: (0, 0))

    in_specs = [
        pl.BlockSpec((tb, INPUT_SIZE), lambda i: (i, 0)),   # raw f32 x streams
        _resident(params["w1"].shape), _resident(params["b1"].shape),
        _resident(params["w2"].shape), _resident(params["b2"].shape),
        _resident(params["w3"].shape), _resident(params["b3"].shape),
        _resident(params["w4"].shape), _resident(params["b4"].shape),
    ]
    out_spec = pl.BlockSpec((tb, OUTPUT_SIZE), lambda i: (i, 0))

    return pl.pallas_call(
        mlp_kernel,
        out_shape=jax.ShapeDtypeStruct((B, OUTPUT_SIZE), jnp.float32),
        grid=grid,
        in_specs=in_specs,
        out_specs=out_spec,
        scratch_shapes=[pltpu.VMEM((tb, IN_PAD), wdt)],
        compiler_params=pltpu.CompilerParams(
            dimension_semantics=("parallel",),       # megacore split on v7x
            vmem_limit_bytes=32 * 1024 * 1024),      # headroom over v5e's 16 MiB default
    )(x,
      params["w1"], params["b1"],
      params["w2"], params["b2"],
      params["w3"], params["b3"],
      params["w4"], params["b4"])


def init_params(key, dtype=jnp.bfloat16):
    """nn.Linear-style init (U(-1/sqrt(fan_in), 1/sqrt(fan_in))).

    Weights are stored as (in, out) -- transpose of PyTorch's layout -- and
    zero-padded to lane-aligned shapes; weights in bf16 (MXU inputs), biases
    in f32 (the f32 bias-add / ReLU path)."""
    sizes = [INPUT_SIZE] + HIDDEN_SIZES + [OUTPUT_SIZE]
    padded_in = [IN_PAD, H1, H2, H3_PAD]
    padded_out = [H1, H2, H3_PAD, OUT_PAD]
    params = {}
    keys = jax.random.split(key, 2 * (len(sizes) - 1))
    for i in range(len(sizes) - 1):
        fan_in, fan_out = sizes[i], sizes[i + 1]
        bound = 1.0 / (fan_in ** 0.5)
        w = jax.random.uniform(keys[2 * i], (fan_in, fan_out),
                               minval=-bound, maxval=bound, dtype=jnp.float32)
        b = jax.random.uniform(keys[2 * i + 1], (fan_out,),
                               minval=-bound, maxval=bound, dtype=jnp.float32)
        w_p = jnp.zeros((padded_in[i], padded_out[i]), jnp.float32)
        w_p = w_p.at[:fan_in, :fan_out].set(w)
        b_p = jnp.zeros((1, padded_out[i]), jnp.float32)
        b_p = b_p.at[0, :fan_out].set(b)
        params[f"w{i + 1}"] = w_p.astype(dtype)   # bf16 MXU operand
        params[f"b{i + 1}"] = b_p                 # f32 bias
    return params


def reference_forward(x, params):
    """Pure-JAX reference mirroring the kernel's numerics (bf16 matmul inputs,
    f32 accumulation / bias / ReLU).  Padded columns are zero so the sliced
    result equals the original NetMLP forward with bf16-rounded operands."""
    wdt = params["w1"].dtype
    h = jnp.zeros((x.shape[0], IN_PAD), jnp.float32).at[:, :INPUT_SIZE].set(x)
    h = h.astype(wdt)
    for i in range(1, 5):
        w = params[f"w{i}"].astype(jnp.float32)
        b = params[f"b{i}"]
        h = jnp.dot(h.astype(jnp.float32), w,
                    precision=jax.lax.Precision.HIGHEST) + b
        if i < 4:
            h = jnp.maximum(h, 0.0).astype(wdt)
    return h[:, :OUTPUT_SIZE]


if __name__ == "__main__":
    key = jax.random.PRNGKey(0)
    pkey, xkey = jax.random.split(key)
    params = init_params(pkey)

    # Small deterministic check (single grid step, tb == 8).
    B = 8
    x = jax.random.normal(xkey, (B, INPUT_SIZE), dtype=jnp.float32)
    out = jax.block_until_ready(net_mlp_forward(x, params))
    ref = reference_forward(x, params)
    assert out.shape == (B, OUTPUT_SIZE)
    assert jnp.allclose(out, ref, atol=2e-3, rtol=2e-3), \
        float(jnp.max(jnp.abs(out - ref)))

    # Larger, non-multiple-of-tile batch: exercises multi-step streaming,
    # resident weights, and the masked partial last block (grid=(2,)).
    B2 = 1000
    x2 = jax.random.normal(jax.random.PRNGKey(1), (B2, INPUT_SIZE),
                           dtype=jnp.float32)
    out2 = jax.block_until_ready(net_mlp_forward(x2, params))
    ref2 = reference_forward(x2, params)
    assert out2.shape == (B2, OUTPUT_SIZE)
    assert jnp.allclose(out2, ref2, atol=2e-3, rtol=2e-3), \
        float(jnp.max(jnp.abs(out2 - ref2)))

    print("KERNEL_OK")
</pallas_src>

<mosaic_0001>
module attributes {stable_mosaic.version = 11 : i64} {
  func.func @mlp_kernel(%arg0: i32, %arg1: memref<8x521xf32, #tpu.memory_space<vmem>>, %arg2: memref<640x256xbf16, #tpu.memory_space<vmem>>, %arg3: memref<1x256xf32, #tpu.memory_space<vmem>>, %arg4: memref<256x128xbf16, #tpu.memory_space<vmem>>, %arg5: memref<1x128xf32, #tpu.memory_space<vmem>>, %arg6: memref<128x128xbf16, #tpu.memory_space<vmem>>, %arg7: memref<1x128xf32, #tpu.memory_space<vmem>>, %arg8: memref<128x128xbf16, #tpu.memory_space<vmem>>, %arg9: memref<1x128xf32, #tpu.memory_space<vmem>>, %arg10: memref<8x12xf32, #tpu.memory_space<vmem>>, %arg11: memref<8x640xbf16, #tpu.memory_space<vmem>>) attributes {dimension_semantics = [#tpu.dimension_semantics<parallel>], iteration_bounds = array<i64: 1>, scalar_prefetch = 0 : i64, scratch_operands = 1 : i64, tpu.core_type = #tpu.core_type<tc>, window_params = [{transform_indices = @transform_0, window_bounds = array<i64: 8, 521>}, {pipeline_mode = #tpu.pipeline_mode<synchronous>, transform_indices = @transform_1, window_bounds = array<i64: 640, 256>}, {pipeline_mode = #tpu.pipeline_mode<synchronous>, transform_indices = @transform_2, window_bounds = array<i64: 1, 256>}, {pipeline_mode = #tpu.pipeline_mode<synchronous>, transform_indices = @transform_3, window_bounds = array<i64: 256, 128>}, {pipeline_mode = #tpu.pipeline_mode<synchronous>, transform_indices = @transform_4, window_bounds = array<i64: 1, 128>}, {pipeline_mode = #tpu.pipeline_mode<synchronous>, transform_indices = @transform_5, window_bounds = array<i64: 128, 128>}, {pipeline_mode = #tpu.pipeline_mode<synchronous>, transform_indices = @transform_6, window_bounds = array<i64: 1, 128>}, {pipeline_mode = #tpu.pipeline_mode<synchronous>, transform_indices = @transform_7, window_bounds = array<i64: 128, 128>}, {pipeline_mode = #tpu.pipeline_mode<synchronous>, transform_indices = @transform_8, window_bounds = array<i64: 1, 128>}, {transform_indices = @transform_9, window_bounds = array<i64: 8, 12>}]} {
    %c0 = arith.constant 0 : index
    %c0_0 = arith.constant 0 : index
    %0 = vector.load %arg1[%c0, %c0_0] : memref<8x521xf32, #tpu.memory_space<vmem>>, vector<8x521xf32>
    %1 = arith.truncf %0 : vector<8x521xf32> to vector<8x521xbf16>
    %c0_1 = arith.constant 0 : index
    %c0_2 = arith.constant 0 : index
    %2 = vector.load %arg11[%c0_1, %c0_2] : memref<8x640xbf16, #tpu.memory_space<vmem>>, vector<8x521xbf16>
    tpu.vector_store %arg11[%c0_1, %c0_2], %1 {strides = array<i32>} : memref<8x640xbf16, #tpu.memory_space<vmem>>, vector<8x521xbf16>,
    %cst = arith.constant 0.000000e+00 : bf16
    %3 = vector.broadcast %cst : bf16 to vector<8x119xbf16>
    %c0_3 = arith.constant 0 : index
    %c521 = arith.constant 521 : index
    %4 = vector.load %arg11[%c0_3, %c521] : memref<8x640xbf16, #tpu.memory_space<vmem>>, vector<8x119xbf16>
    tpu.vector_store %arg11[%c0_3, %c521], %3 {strides = array<i32>} : memref<8x640xbf16, #tpu.memory_space<vmem>>, vector<8x119xbf16>,
    %c0_4 = arith.constant 0 : index
    %c0_5 = arith.constant 0 : index
    %5 = vector.load %arg11[%c0_4, %c0_5] : memref<8x640xbf16, #tpu.memory_space<vmem>>, vector<8x640xbf16>
    %c0_6 = arith.constant 0 : index
    %c0_7 = arith.constant 0 : index
    %6 = vector.load %arg2[%c0_6, %c0_7] : memref<640x256xbf16, #tpu.memory_space<vmem>>, vector<640x256xbf16>
    %cst_8 = arith.constant dense<0.000000e+00> : vector<8x256xf32>
    %7 = tpu.matmul %5, %6, %cst_8 {dimension_numbers = #tpu.dot_dimension_numbers<[1], [0], [0], [1], [0, 0, 1, 1], [], []>} : vector<8x640xbf16>, vector<640x256xbf16>, vector<8x256xf32> -> vector<8x256xf32>
    %c0_9 = arith.constant 0 : index
    %c0_10 = arith.constant 0 : index
    %8 = vector.load %arg3[%c0_9, %c0_10] : memref<1x256xf32, #tpu.memory_space<vmem>>, vector<1x256xf32>
    %9 = vector.broadcast %8 : vector<1x256xf32> to vector<8x256xf32>
    %10 = arith.addf %7, %9 : vector<8x256xf32>
    %cst_11 = arith.constant 0.000000e+00 : f32
    %11 = vector.broadcast %cst_11 : f32 to vector<8x256xf32>
    %12 = arith.maximumf %10, %11 : vector<8x256xf32>
    %13 = arith.truncf %12 : vector<8x256xf32> to vector<8x256xbf16>
    %c0_12 = arith.constant 0 : index
    %c0_13 = arith.constant 0 : index
    %14 = vector.load %arg4[%c0_12, %c0_13] : memref<256x128xbf16, #tpu.memory_space<vmem>>, vector<256x128xbf16>
    %cst_14 = arith.constant dense<0.000000e+00> : vector<8x128xf32>
    %15 = tpu.matmul %13, %14, %cst_14 {dimension_numbers = #tpu.dot_dimension_numbers<[1], [0], [0], [1], [0, 0, 1, 1], [], []>} : vector<8x256xbf16>, vector<256x128xbf16>, vector<8x128xf32> -> vector<8x128xf32>
    %c0_15 = arith.constant 0 : index
    %c0_16 = arith.constant 0 : index
    %16 = vector.load %arg5[%c0_15, %c0_16] : memref<1x128xf32, #tpu.memory_space<vmem>>, vector<1x128xf32>
    %17 = vector.broadcast %16 : vector<1x128xf32> to vector<8x128xf32>
    %18 = arith.addf %15, %17 : vector<8x128xf32>
    %cst_17 = arith.constant 0.000000e+00 : f32
    %19 = vector.broadcast %cst_17 : f32 to vector<8x128xf32>
    %20 = arith.maximumf %18, %19 : vector<8x128xf32>
    %21 = arith.truncf %20 : vector<8x128xf32> to vector<8x128xbf16>
    %c0_18 = arith.constant 0 : index
    %c0_19 = arith.constant 0 : index
    %22 = vector.load %arg6[%c0_18, %c0_19] : memref<128x128xbf16, #tpu.memory_space<vmem>>, vector<128x128xbf16>
    %cst_20 = arith.constant dense<0.000000e+00> : vector<8x128xf32>
    %23 = tpu.matmul %21, %22, %cst_20 {dimension_numbers = #tpu.dot_dimension_numbers<[1], [0], [0], [1], [0, 0, 1, 1], [], []>} : vector<8x128xbf16>, vector<128x128xbf16>, vector<8x128xf32> -> vector<8x128xf32>
    %c0_21 = arith.constant 0 : index
    %c0_22 = arith.constant 0 : index
    %24 = vector.load %arg7[%c0_21, %c0_22] : memref<1x128xf32, #tpu.memory_space<vmem>>, vector<1x128xf32>
    %25 = vector.broadcast %24 : vector<1x128xf32> to vector<8x128xf32>
    %26 = arith.addf %23, %25 : vector<8x128xf32>
    %cst_23 = arith.constant 0.000000e+00 : f32
    %27 = vector.broadcast %cst_23 : f32 to vector<8x128xf32>
    %28 = arith.maximumf %26, %27 : vector<8x128xf32>
    %29 = arith.truncf %28 : vector<8x128xf32> to vector<8x128xbf16>
    %c0_24 = arith.constant 0 : index
    %c0_25 = arith.constant 0 : index
    %30 = vector.load %arg8[%c0_24, %c0_25] : memref<128x128xbf16, #tpu.memory_space<vmem>>, vector<128x128xbf16>
    %cst_26 = arith.constant dense<0.000000e+00> : vector<8x128xf32>
    %31 = tpu.matmul %29, %30, %cst_26 {dimension_numbers = #tpu.dot_dimension_numbers<[1], [0], [0], [1], [0, 0, 1, 1], [], []>} : vector<8x128xbf16>, vector<128x128xbf16>, vector<8x128xf32> -> vector<8x128xf32>
    %c0_27 = arith.constant 0 : index
    %c0_28 = arith.constant 0 : index
    %32 = vector.load %arg9[%c0_27, %c0_28] : memref<1x128xf32, #tpu.memory_space<vmem>>, vector<1x128xf32>
    %33 = vector.broadcast %32 : vector<1x128xf32> to vector<8x128xf32>
    %34 = arith.addf %31, %33 : vector<8x128xf32>
    %35 = vector.extract_strided_slice %34 {offsets = [0, 0], sizes = [8, 12], strides = [1, 1]} : vector<8x128xf32> to vector<8x12xf32>
    %c0_29 = arith.constant 0 : index
    %c0_30 = arith.constant 0 : index
    %36 = vector.load %arg10[%c0_29, %c0_30] : memref<8x12xf32, #tpu.memory_space<vmem>>, vector<8x12xf32>
    tpu.vector_store %arg10[%c0_29, %c0_30], %35 {strides = array<i32>} : memref<8x12xf32, #tpu.memory_space<vmem>>, vector<8x12xf32>,
    return
  }
  func.func @transform_0(%arg0: i32) -> (i32, i32) {
    %c0_i32 = arith.constant 0 : i32
    %c0_i32_0 = arith.constant 0 : i32
    return %arg0, %c0_i32 : i32, i32
  }
  func.func @transform_1(%arg0: i32) -> (i32, i32) {
    %c0_i32 = arith.constant 0 : i32
    %c0_i32_0 = arith.constant 0 : i32
    %c0_i32_1 = arith.constant 0 : i32
    return %c0_i32, %c0_i32_0 : i32, i32
  }
  func.func @transform_2(%arg0: i32) -> (i32, i32) {
    %c0_i32 = arith.constant 0 : i32
    %c0_i32_0 = arith.constant 0 : i32
    %c0_i32_1 = arith.constant 0 : i32
    return %c0_i32, %c0_i32_0 : i32, i32
  }
  func.func @transform_3(%arg0: i32) -> (i32, i32) {
    %c0_i32 = arith.constant 0 : i32
    %c0_i32_0 = arith.constant 0 : i32
    %c0_i32_1 = arith.constant 0 : i32
    return %c0_i32, %c0_i32_0 : i32, i32
  }
  func.func @transform_4(%arg0: i32) -> (i32, i32) {
    %c0_i32 = arith.constant 0 : i32
    %c0_i32_0 = arith.constant 0 : i32
    %c0_i32_1 = arith.constant 0 : i32
    return %c0_i32, %c0_i32_0 : i32, i32
  }
  func.func @transform_5(%arg0: i32) -> (i32, i32) {
    %c0_i32 = arith.constant 0 : i32
    %c0_i32_0 = arith.constant 0 : i32
    %c0_i32_1 = arith.constant 0 : i32
    return %c0_i32, %c0_i32_0 : i32, i32
  }
  func.func @transform_6(%arg0: i32) -> (i32, i32) {
    %c0_i32 = arith.constant 0 : i32
    %c0_i32_0 = arith.constant 0 : i32
    %c0_i32_1 = arith.constant 0 : i32
    return %c0_i32, %c0_i32_0 : i32, i32
  }
  func.func @transform_7(%arg0: i32) -> (i32, i32) {
    %c0_i32 = arith.constant 0 : i32
    %c0_i32_0 = arith.constant 0 : i32
    %c0_i32_1 = arith.constant 0 : i32
    return %c0_i32, %c0_i32_0 : i32, i32
  }
  func.func @transform_8(%arg0: i32) -> (i32, i32) {
    %c0_i32 = arith.constant 0 : i32
    %c0_i32_0 = arith.constant 0 : i32
    %c0_i32_1 = arith.constant 0 : i32
    return %c0_i32, %c0_i32_0 : i32, i32
  }
  func.func @transform_9(%arg0: i32) -> (i32, i32) {
    %c0_i32 = arith.constant 0 : i32
    %c0_i32_0 = arith.constant 0 : i32
    return %arg0, %c0_i32 : i32, i32
  }
}

</mosaic_0001>

<bundles_post_ra>
// kernel: tpu_custom_call.1
= control target key start
LH: loop header
LB: loop body
LE: loop exit
PB: predicated region body
PF: predicated region fallthrough
CT: control target
= control target key end

     0   :  { %14 = vsyncpa [#allocation4], 0  ;;  %s1900_s0 = inlined_call_operand.hbm [shape: f32[8,521], index: 0, kind: input, shape index: {}]   ;;  %s1901_s1 = inlined_call_operand.hbm [shape: bf16[640,256], index: 1, kind: input, shape index: {}]   ;;  %s1902_s2 = inlined_call_operand.vmem [shape: f32[1,256], index: 2, kind: input, shape index: {}]   ;;  %s1903_s3 = inlined_call_operand.hbm [shape: bf16[256,128], index: 3, kind: input, shape index: {}]   ;;  %s1904_s4 = inlined_call_operand.vmem [shape: f32[1,128], index: 4, kind: input, shape index: {}]   ;;  %s1905_s5 = inlined_call_operand.hbm [shape: bf16[128,128], index: 5, kind: input, shape index: {}]   ;;  %s1906_s6 = inlined_call_operand.vmem [shape: f32[1,128], index: 6, kind: input, shape index: {}]   ;;  %s1907_s7 = inlined_call_operand.hbm [shape: bf16[128,128], index: 7, kind: input, shape index: {}]   ;;  %s1908_s8 = inlined_call_operand.vmem [shape: f32[1,128], index: 8, kind: input, shape index: {}]   ;;  %s1909_s9 = inlined_call_operand.hbm [shape: f32[8,12], index: 9, kind: output, shape index: {}]  }
   0x1   :  { %15 = vsyncpa [#allocation7], 0 }
   0x2   :  { %16 = vsyncpa [#allocation10], 0 }
   0x3   :  { %17 = vsyncpa [#allocation5], 0  ;;  %s1716_s30 = smov [#allocation6]   ;;  %s1576_s13 = scalar_lea.hbm %s1901_s1, 10240 }
   0x4   :  { %s33_s10 = sshll.u32 %s1716_s30, 4  ;;  %p1577_p0 = scmp.ne.s32.totalorder %s1901_s1, %s1576_s13  ;;  %s34_s10 = int_to_ptr.vmem [resolvable:$true] %s33_s10 }
   0x5   :  { %p1580_p1 = scmp.lt.u32.totalorder %s1576_s13, %s1901_s1 }
   0x7   :  { %p1582_p2 = pnand %p1580_p1, %p1577_p0 }
   0x9   :  { %1585 = shalt.err (!%p1582_p2)
}
   0xa   :  { %s1586_s18 = scalar_lea.vmem %s34_s10, 10240  ;;  %p1591_p4 = scmp.lt.s32.totalorder %s34_s10, %s34_s10 }
   0xb   :  { %p1587_p3 = scmp.ne.s32.totalorder %s34_s10, %s1586_s18  ;;  %p1592_p5 = scmp.lt.s32.totalorder %s1586_s18, %s1586_s18 }
   0xd   :  { %p1593_p6 = por %p1592_p5, %p1591_p4 }
   0xf   :  { %p1594_p7 = pnand %p1593_p6, %p1587_p3 }
  0x11   :  { %1597 = shalt.err (!%p1594_p7)
}
  0x12   :  { %s1717_s19 = smov 128   ;;  %s1718_s20 = smov 8  }
  0x13   :  { %39 = dma.hbm_to_vmem [thread:$0]  %s1901_s1, 10240, %s34_s10, [#allocation7], %s1717_s19, %s1717_s19, %s1718_s20  }
  0x14   :  { %s1719_s23 = smov [#allocation9]   ;;  %s1720_s25 = smov [#allocation3]  }
  0x15   :  { %s61_s24 = sshll.u32 %s1719_s23, 4  ;;  %s24_s26 = sshll.u32 %s1720_s25, 4  ;;  %s62_s24 = int_to_ptr.vmem [resolvable:$true] %s61_s24  ;;  %s25_s26 = int_to_ptr.vmem [resolvable:$true] %s24_s26 }
  0x16   :  { %s1598_s29 = scalar_lea.hbm %s1905_s5, 1024 }
  0x17   :  { %p1599_p8 = scmp.ne.s32.totalorder %s1905_s5, %s1598_s29  ;;  %p1602_p9 = scmp.lt.u32.totalorder %s1598_s29, %s1905_s5 }
  0x19   :  { %p1604_p10 = pnand %p1602_p9, %p1599_p8 }
  0x1b   :  { %1607 = shalt.err (!%p1604_p10)
}
  0x1c   :  { %s1608_s1 = scalar_lea.vmem %s62_s24, 1024  ;;  %p1613_p12 = scmp.lt.s32.totalorder %s62_s24, %s62_s24 }
  0x1d   :  { %p1609_p11 = scmp.ne.s32.totalorder %s62_s24, %s1608_s1  ;;  %p1614_p13 = scmp.lt.s32.totalorder %s1608_s1, %s1608_s1 }
  0x1f   :  { %p1615_p0 = por %p1614_p13, %p1613_p12 }
  0x21   :  { %p1616_p1 = pnand %p1615_p0, %p1609_p11 }
  0x23   :  { %1619 = shalt.err (!%p1616_p1)
}
  0x24   :  { %s1721_s10 = smov 64   ;;  %s1722_s14 = smov 4  }
  0x25   :  { %67 = dma.hbm_to_vmem [thread:$0]  %s1905_s5, 1024, %s62_s24, [#allocation10], %s1721_s10, %s1721_s10, %s1722_s14  }
  0x26   :  { %s1620_s19 = scalar_lea.hbm %s1900_s0, 640 }
  0x27   :  { %p1621_p2 = scmp.ne.s32.totalorder %s1900_s0, %s1620_s19  ;;  %p1624_p3 = scmp.lt.u32.totalorder %s1620_s19, %s1900_s0 }
  0x29   :  { %p1626_p4 = pnand %p1624_p3, %p1621_p2 }
  0x2b   :  { %1629 = shalt.err (!%p1626_p4)
}
  0x2c   :  { %s1630_s25 = scalar_lea.vmem %s25_s26, 640  ;;  %p1635_p6 = scmp.lt.s32.totalorder %s25_s26, %s25_s26 }
  0x2d   :  { %p1631_p5 = scmp.ne.s32.totalorder %s25_s26, %s1630_s25  ;;  %p1636_p7 = scmp.lt.s32.totalorder %s1630_s25, %s1630_s25 }
  0x2f   :  { %p1637_p8 = por %p1636_p7, %p1635_p6 }
  0x31   :  { %p1638_p9 = pnand %p1637_p8, %p1631_p5 }
  0x33   :  { %1641 = shalt.err (!%p1638_p9)
}
  0x34   :  { %27 = dma.hbm_to_vmem [thread:$0]  %s1900_s0, 640, %s25_s26, [#allocation4]  }
  0x35   :  { %s1723_s27 = smov [#allocation8]   ;;  %s1724_s29 = smov [#allocation11]  }
  0x36   :  { %s47_s28 = sshll.u32 %s1723_s27, 4  ;;  %s75_s30 = sshll.u32 %s1724_s29, 4  ;;  %s48_s28 = int_to_ptr.vmem [resolvable:$true] %s47_s28  ;;  %s76_s30 = int_to_ptr.vmem [resolvable:$true] %s75_s30 }
  0x37   :  { %s1642_s13 = scalar_lea.hbm %s1903_s3, 2048 }
  0x38   :  { %p1643_p10 = scmp.ne.s32.totalorder %s1903_s3, %s1642_s13  ;;  %p1646_p11 = scmp.lt.u32.totalorder %s1642_s13, %s1903_s3 }
  0x3a   :  { %p1648_p12 = pnand %p1646_p11, %p1643_p10 }
  0x3c   :  { %1651 = shalt.err (!%p1648_p12)
}
  0x3d   :  { %s1652_s0 = scalar_lea.vmem %s48_s28, 2048  ;;  %p1657_p0 = scmp.lt.s32.totalorder %s48_s28, %s48_s28 }
  0x3e   :  { %p1653_p13 = scmp.ne.s32.totalorder %s48_s28, %s1652_s0  ;;  %p1658_p1 = scmp.lt.s32.totalorder %s1652_s0, %s1652_s0 }
  0x40   :  { %p1659_p2 = por %p1658_p1, %p1657_p0 }
  0x42   :  { %p1660_p3 = pnand %p1659_p2, %p1653_p13 }
  0x44   :  { %1663 = shalt.err (!%p1660_p3)
}
  0x45   :  { %53 = dma.hbm_to_vmem [thread:$0]  %s1903_s3, 2048, %s48_s28, [#allocation7], %s1721_s10, %s1721_s10, %s1722_s14  }
  0x46   :  { %s1664_s21 = scalar_lea.hbm %s1907_s7, 1024 }
  0x47   :  { %p1665_p4 = scmp.ne.s32.totalorder %s1907_s7, %s1664_s21  ;;  %p1668_p5 = scmp.lt.u32.totalorder %s1664_s21, %s1907_s7 }
  0x49   :  { %p1670_p6 = pnand %p1668_p5, %p1665_p4 }
  0x4b   :  { %1673 = shalt.err (!%p1670_p6)
}
  0x4c   :  { %s1674_s24 = scalar_lea.vmem %s76_s30, 1024  ;;  %p1679_p8 = scmp.lt.s32.totalorder %s76_s30, %s76_s30 }
  0x4d   :  { %p1675_p7 = scmp.ne.s32.totalorder %s76_s30, %s1674_s24  ;;  %p1680_p9 = scmp.lt.s32.totalorder %s1674_s24, %s1674_s24 }
  0x4f   :  { %p1681_p10 = por %p1680_p9, %p1679_p8 }
  0x51   :  { %p1682_p11 = pnand %p1681_p10, %p1675_p7 }
  0x53   :  { %1685 = shalt.err (!%p1682_p11)
}
  0x54   :  { %81 = dma.hbm_to_vmem [thread:$0]  %s1907_s7, 1024, %s76_s30, [#allocation10], %s1721_s10, %s1721_s10, %s1722_s14  }
  0x55   :  { %1708 = dma.done.wait [#allocation4], 640  }
  0x56   :  { %1709 = vsyncadd [#allocation4], 4294966656 }
  0x57   :  { %1710 = dma.done.wait [#allocation7], 12288  }
  0x58   :  { %1711 = vsyncadd [#allocation7], 4294955008 }
  0x59   :  { %1712 = dma.done.wait [#allocation10], 2048  }
  0x5a   :  { %1713 = vsyncadd [#allocation10], 4294965248  ;;  %v1725_v0 = vmov 0   ;;  %v1419_v1 = vld [vmem:[#allocation6 + $0x4] ss:$8 sps:$4 sm:$0xff]   ;;  %v1849_v14 = vld [vmem:[#allocation3] sm:$0xff] }
  0x5b   :  { %759 = vmatprep.mubr.bf16.mxu1 %v1725_v0  ;;  %v1421_v2 = vld [vmem:[#allocation6] ss:$8 sps:$4 sm:$0xff]   ;;  %645 = vmatprep.subr.bf16.mxu0 %v1419_v1  ;;  %v1422_v3 = vld [vmem:[#allocation6 + $0x14] ss:$8 sps:$4 sm:$0xff]   ;;  %v1424_v4 = vld [vmem:[#allocation6 + $0x10] ss:$8 sps:$4 sm:$0xff]   ;;  %v1573_v58 = vpack.c.bf16 %v1849_v14, %v1849_v14 }
  0x5c   :  { %646 = vmatpush1.bf16.msra.mxu0 %v1421_v2  ;;  %v1425_v5 = vld [vmem:[#allocation6 + $0x24] ss:$8 sps:$4 sm:$0xff]   ;;  %v1427_v6 = vld [vmem:[#allocation6 + $0x20] ss:$8 sps:$4 sm:$0xff]   ;;  %v1428_v7 = vld [vmem:[#allocation6 + $0x34] ss:$8 sps:$4 sm:$0xff]  }
  0x5d   :  { %647 = vmatprep.subr.bf16.mxu0 %v1422_v3  ;;  %v1430_v8 = vld [vmem:[#allocation6 + $0x30] ss:$8 sps:$4 sm:$0xff]   ;;  %v1431_v9 = vld [vmem:[#allocation6 + $0x44] ss:$8 sps:$4 sm:$0xff]   ;;  %v1433_v10 = vld [vmem:[#allocation6 + $0x40] ss:$8 sps:$4 sm:$0xff]  }
  0x5e   :  { %v1434_v11 = vld [vmem:[#allocation6 + $0x54] ss:$8 sps:$4 sm:$0xff]   ;;  %v1436_v12 = vld [vmem:[#allocation6 + $0x50] ss:$8 sps:$4 sm:$0xff]   ;;  %v1437_v13 = vld [vmem:[#allocation6 + $0x64] ss:$8 sps:$4 sm:$0xff]  }
  0x5f   :  { %v101_v15 = vld [vmem:[#allocation3 + $0x8] sm:$0xff]  ;;  %v1440_v17 = vld [vmem:[#allocation6 + $0x74] ss:$8 sps:$4 sm:$0xff]   ;;  %v1442_v19 = vld [vmem:[#allocation6 + $0x70] ss:$8 sps:$4 sm:$0xff]   ;;  %vm128_vm0 = vcmask 68608  }
  0x60   :  { %648 = vmatpush1.bf16.msra.mxu0 %v1424_v4  ;;  %v1439_v16 = vld [vmem:[#allocation6 + $0x60] ss:$8 sps:$4 sm:$0xff]   ;;  %v1572_v18 = vpack.c.bf16 %v101_v15, %v101_v15  ;;  %v1443_v20 = vld [vmem:[#allocation6 + $0x84] ss:$8 sps:$4 sm:$0xff]   ;;  %v1446_v22 = vld [vmem:[#allocation6 + $0x94] ss:$8 sps:$4 sm:$0xff]  }
  0x61   :  { %649 = vmatprep.subr.bf16.mxu0 %v1425_v5  ;;  %v1445_v21 = vld [vmem:[#allocation6 + $0x80] ss:$8 sps:$4 sm:$0xff]   ;;  %v1491_v23 = vld [vmem:[#allocation6 + $0x204] ss:$8 sps:$4 sm:$0xff]   ;;  %v1448_v24 = vld [vmem:[#allocation6 + $0x90] ss:$8 sps:$4 sm:$0xff]  }
  0x62   :  { %677 = vmatprep.mubr.bf16.mxu0 %v1572_v18  ;;  %v1449_v25 = vld [vmem:[#allocation6 + $0xa4] ss:$8 sps:$4 sm:$0xff]   ;;  %727 = vmatprep.subr.bf16.mxu1 %v1491_v23  ;;  %v1496_v26 = vld [vmem:[#allocation6 + $0x200] ss:$8 sps:$4 sm:$0xff]   ;;  %v1497_v27 = vld [vmem:[#allocation6 + $0x214] ss:$8 sps:$4 sm:$0xff]  }
  0x63   :  { %728 = vmatpush1.bf16.msra.mxu1 %v1496_v26  ;;  %v1502_v28 = vld [vmem:[#allocation6 + $0x210] ss:$8 sps:$4 sm:$0xff]   ;;  %v1503_v29 = vld [vmem:[#allocation6 + $0x224] ss:$8 sps:$4 sm:$0xff]   ;;  %v1451_v30 = vld [vmem:[#allocation6 + $0xa0] ss:$8 sps:$4 sm:$0xff]  }
  0x64   :  { %650 = vmatpush1.bf16.msra.mxu0 %v1427_v6  ;;  %729 = vmatprep.subr.bf16.mxu1 %v1497_v27  ;;  %v1452_v31 = vld [vmem:[#allocation6 + $0xb4] ss:$8 sps:$4 sm:$0xff]   ;;  %v1508_v32 = vld [vmem:[#allocation6 + $0x220] ss:$8 sps:$4 sm:$0xff]   ;;  %v1454_v34 = vld [vmem:[#allocation6 + $0xb0] ss:$8 sps:$4 sm:$0xff]  }
  0x65   :  { %651 = vmatprep.subr.bf16.mxu0 %v1428_v7  ;;  %v1509_v33 = vld [vmem:[#allocation6 + $0x234] ss:$8 sps:$4 sm:$0xff]   ;;  %v1455_v35 = vld [vmem:[#allocation6 + $0xc4] ss:$8 sps:$4 sm:$0xff]   ;;  %v1514_v36 = vld [vmem:[#allocation6 + $0x230] ss:$8 sps:$4 sm:$0xff]  }
  0x66   :  { %v1515_v37 = vld [vmem:[#allocation6 + $0x244] ss:$8 sps:$4 sm:$0xff]   ;;  %v1457_v38 = vld [vmem:[#allocation6 + $0xc0] ss:$8 sps:$4 sm:$0xff]   ;;  %v1458_v39 = vld [vmem:[#allocation6 + $0xd4] ss:$8 sps:$4 sm:$0xff]  }
  0x67   :  { %730 = vmatpush1.bf16.msra.mxu1 %v1502_v28  ;;  %v1520_v40 = vld [vmem:[#allocation6 + $0x240] ss:$8 sps:$4 sm:$0xff]   ;;  %v1521_v41 = vld [vmem:[#allocation6 + $0x254] ss:$8 sps:$4 sm:$0xff]   ;;  %v1460_v42 = vld [vmem:[#allocation6 + $0xd0] ss:$8 sps:$4 sm:$0xff]  }
  0x68   :  { %652 = vmatpush1.bf16.msra.mxu0 %v1430_v8  ;;  %731 = vmatprep.subr.bf16.mxu1 %v1503_v29  ;;  %v1461_v43 = vld [vmem:[#allocation6 + $0xe4] ss:$8 sps:$4 sm:$0xff]   ;;  %v1526_v44 = vld [vmem:[#allocation6 + $0x250] ss:$8 sps:$4 sm:$0xff]   ;;  %vm130_vm1 = vcmask 1043528   ;;  %vm1727_vm2 = vmmov 0  }
  0x69   :  { %653 = vmatprep.subr.bf16.mxu0 %v1431_v9  ;;  %v1527_v45 = vld [vmem:[#allocation6 + $0x264] ss:$8 sps:$4 sm:$0xff]   ;;  %v104_v46 = vld [vmem:[#allocation3 + $0x20] sm:$0xff]  ;;  %v103_v48 = vld [vmem:[#allocation3 + $0x18] sm:$0xff]  ;;  %s1728_s11 = smov [#allocation12]   ;;  %vm1173_vm3 = vcmask 97280  }
  0x6a   :  { %v1851_v47 = vld [vmem:[#allocation3 + $0x10] sm:$0xff]  ;;  %v1317_v50 = vpack.c.bf16 %v104_v46, %v104_v46  ;;  %v1464_v51 = vld [vmem:[#allocation6 + $0xf4] ss:$8 sps:$4 sm:$0xff]   ;;  %v1466_v54 = vld [vmem:[#allocation6 + $0xf0] ss:$8 sps:$4 sm:$0xff]   ;;  %v1574_v61 = vpack.c.bf16 %v103_v48, %v103_v48  ;;  %s1181_s12 = sshll.u32 %s1728_s11, 4  ;;  %s1182_s12 = int_to_ptr.vmem [resolvable:$true] %s1181_s12 }
  0x6b   :  { %732 = vmatpush1.bf16.msra.mxu1 %v1508_v32  ;;  %v1463_v49 = vld [vmem:[#allocation6 + $0xe0] ss:$8 sps:$4 sm:$0xff]   ;;  %v1533_v53 = vld [vmem:[#allocation6 + $0x274] ss:$8 sps:$4 sm:$0xff]   ;;  %v1469_v55 = vld [vmem:[#allocation6 + $0x104] ss:$8 sps:$4 sm:$0xff]   ;;  %p1691_p13 = scmp.lt.s32.totalorder %s1182_s12, %s1182_s12 }
  0x6c   :  { %654 = vmatpush1.bf16.msra.mxu0 %v1433_v10  ;;  %733 = vmatprep.subr.bf16.mxu1 %v1509_v33  ;;  %v1532_v52 = vld [vmem:[#allocation6 + $0x260] ss:$8 sps:$4 sm:$0xff]   ;;  %129 = vst.msk [vmem:[#allocation2 + $0x10] sm:$0xf] %vm128_vm0, %v1317_v50  ;;  %v1538_v57 = vld [vmem:[#allocation6 + $0x270] ss:$8 sps:$4 sm:$0xff]  }
  0x6d   :  { %655 = vmatprep.subr.bf16.mxu0 %v1434_v11  ;;  %131 = vst.msk [vmem:[#allocation2 + $0x10] sm:$0xf] %vm130_vm1, %v1725_v0  ;;  %v1467_v56 = vld [vmem:[#allocation6 + $0x100] ss:$8 sps:$4 sm:$0xff]   ;;  %v1472_v59 = vld [vmem:[#allocation6 + $0x114] ss:$8 sps:$4 sm:$0xff]  }
  0x6e   :  { %v1540_v60 = vld [vmem:[#allocation8 + $0x40] sm:$0xff]   ;;  %v1542_v63 = vld [vmem:[#allocation8 + $0x48] sm:$0xff]   ;;  %v1470_v1 = vld [vmem:[#allocation6 + $0x110] ss:$8 sps:$4 sm:$0xff]  }
  0x6f   :  { %734 = vmatpush1.bf16.msra.mxu1 %v1514_v36  ;;  %v1541_v62 = vld [vmem:[#allocation8] sm:$0xff]   ;;  %v1543_v3 = vld [vmem:[#allocation8 + $0x8] sm:$0xff]   ;;  %v1544_v4 = vld [vmem:[#allocation8 + $0x50] sm:$0xff]  }
  0x70   :  { %656 = vmatpush1.bf16.msra.mxu0 %v1436_v12  ;;  %735 = vmatprep.subr.bf16.mxu1 %v1515_v37  ;;  %v1475_v2 = vld [vmem:[#allocation6 + $0x124] ss:$8 sps:$4 sm:$0xff]   ;;  %v1473_v5 = vld [vmem:[#allocation6 + $0x120] ss:$8 sps:$4 sm:$0xff]   ;;  %v1478_v6 = vld [vmem:[#allocation6 + $0x134] ss:$8 sps:$4 sm:$0xff]   ;;  %v1575_v37 = vpack.c.bf16 %v1851_v47, %v1851_v47 }
  0x71   :  { %657 = vmatprep.subr.bf16.mxu0 %v1437_v13  ;;  %v1545_v7 = vld [vmem:[#allocation8 + $0x10] sm:$0xff]   ;;  %v1546_v8 = vld [vmem:[#allocation8 + $0x58] sm:$0xff]   ;;  %v1481_v10 = vld [vmem:[#allocation6 + $0x144] ss:$8 sps:$4 sm:$0xff]  }
  0x72   :  { %v1476_v9 = vld [vmem:[#allocation6 + $0x130] ss:$8 sps:$4 sm:$0xff]   ;;  %v1548_v12 = vld [vmem:[#allocation8 + $0x60] sm:$0xff]   ;;  %v1484_v14 = vld [vmem:[#allocation6 + $0x154] ss:$8 sps:$4 sm:$0xff]  }
  0x73   :  { %736 = vmatpush1.bf16.msra.mxu1 %v1520_v40  ;;  %v1547_v11 = vld [vmem:[#allocation8 + $0x18] sm:$0xff]   ;;  %v1479_v13 = vld [vmem:[#allocation6 + $0x140] ss:$8 sps:$4 sm:$0xff]   ;;  %v1519_v29 = vld [vmem:[#allocation6 + $0x1c4] ss:$8 sps:$4 sm:$0xff]  }
  0x74   :  { %658 = vmatpush1.bf16.msra.mxu0 %v1439_v16  ;;  %737 = vmatprep.subr.bf16.mxu1 %v1521_v41  ;;  %v1539_v0 = vld [vmem:[#allocation2 + $0x10] ss:$0 sps:$4 sm:$0xff]   ;;  %v1549_v15 = vld [vmem:[#allocation8 + $0x20] sm:$0xff]   ;;  %v1482_v16 = vld [vmem:[#allocation6 + $0x150] ss:$8 sps:$4 sm:$0xff]  }
  0x75   :  { %659 = vmatprep.subr.bf16.mxu0 %v1440_v17  ;;  %v1487_v17 = vld [vmem:[#allocation6 + $0x164] ss:$8 sps:$4 sm:$0xff]   ;;  %v1485_v18 = vld [vmem:[#allocation6 + $0x160] ss:$8 sps:$4 sm:$0xff]   ;;  %v1501_v23 = vld [vmem:[#allocation6 + $0x194] ss:$8 sps:$4 sm:$0xff]  }
  0x76   :  { %v1505_v26 = vld [vmem:[#allocation6 + $0x1a0] ss:$8 sps:$4 sm:$0xff]   ;;  %v1513_v27 = vld [vmem:[#allocation6 + $0x1b4] ss:$8 sps:$4 sm:$0xff]   ;;  %v1511_v28 = vld [vmem:[#allocation6 + $0x1b0] ss:$8 sps:$4 sm:$0xff]  }
  0x77   :  { %738 = vmatpush1.bf16.msra.mxu1 %v1526_v44  ;;  %v1523_v32 = vld [vmem:[#allocation6 + $0x1d0] ss:$8 sps:$4 sm:$0xff]   ;;  %v1531_v33 = vld [vmem:[#allocation6 + $0x1e4] ss:$8 sps:$4 sm:$0xff]   ;;  %v1726_v44 = vmov 0.0  }
  0x78   :  { %660 = vmatpush1.bf16.msra.mxu0 %v1442_v19  ;;  %739 = vmatprep.subr.bf16.mxu1 %v1527_v45  ;;  %v1490_v19 = vld [vmem:[#allocation6 + $0x174] ss:$8 sps:$4 sm:$0xff]   ;;  %v1535_v36 = vld [vmem:[#allocation6 + $0x1f0] ss:$8 sps:$4 sm:$0xff]  }
  0x79   :  { %661 = vmatprep.subr.bf16.mxu0 %v1443_v20  ;;  %v1488_v20 = vld [vmem:[#allocation6 + $0x170] ss:$8 sps:$4 sm:$0xff]  }
  0x7a   :  { %v1552_v40 = vld [vmem:[#allocation8 + $0x70] sm:$0xff]  }
  0x7b   :  { %740 = vmatpush1.bf16.msra.mxu1 %v1532_v52  ;;  %v1553_v41 = vld [vmem:[#allocation8 + $0x30] sm:$0xff]   ;;  %v215_v52 = vld [vmem:[%s1902_s2] sm:$0x3] }
  0x7c   :  { %662 = vmatpush1.bf16.msra.mxu0 %v1445_v21  ;;  %741 = vmatprep.subr.bf16.mxu1 %v1533_v53  ;;  %v1495_v21 = vld [vmem:[#allocation6 + $0x184] ss:$8 sps:$4 sm:$0xff]  }
  0x7d   :  { %663 = vmatprep.subr.bf16.mxu0 %v1446_v22  ;;  %v1493_v22 = vld [vmem:[#allocation6 + $0x180] ss:$8 sps:$4 sm:$0xff]  }
  0x7f   :  { %742 = vmatpush1.bf16.msra.mxu1 %v1538_v57 }
  0x80   :  { %664 = vmatpush1.bf16.msra.mxu0 %v1448_v24  ;;  %1318 = vmatprep.subr.bf16.mxu1 %v1540_v60  ;;  %v1499_v24 = vld [vmem:[#allocation6 + $0x190] ss:$8 sps:$4 sm:$0xff]  }
  0x81   :  { %665 = vmatprep.subr.bf16.mxu0 %v1449_v25  ;;  %v1507_v25 = vld [vmem:[#allocation6 + $0x1a4] ss:$8 sps:$4 sm:$0xff]  }
  0x82   :  { %760 = vmatmul.mubr.bf16.vlgmr.msra.gmra.mrb[0].mxu1 %v1539_v0 }
  0x83   :  { %1319 = vmatpush3.bf16.msra.mxu1 %v1541_v62 }
  0x84   :  { %666 = vmatpush1.bf16.msra.mxu0 %v1451_v30  ;;  %1320 = vmatprep.subr.bf16.mxu1 %v1542_v63  ;;  %v1517_v30 = vld [vmem:[#allocation6 + $0x1c0] ss:$8 sps:$4 sm:$0xff]  }
  0x85   :  { %667 = vmatprep.subr.bf16.mxu0 %v1452_v31  ;;  %v1525_v31 = vld [vmem:[#allocation6 + $0x1d4] ss:$8 sps:$4 sm:$0xff]  }
  0x87   :  { %1321 = vmatpush3.bf16.msra.mxu1 %v1543_v3  ;;  %v1556_v3 = vld [vmem:[#allocation9] sm:$0xff]  }
  0x88   :  { %668 = vmatpush1.bf16.msra.mxu0 %v1454_v34  ;;  %1322 = vmatprep.subr.bf16.mxu1 %v1544_v4  ;;  %v1529_v34 = vld [vmem:[#allocation6 + $0x1e0] ss:$8 sps:$4 sm:$0xff]  }
  0x89   :  { %669 = vmatprep.subr.bf16.mxu0 %v1455_v35  ;;  %v1537_v35 = vld [vmem:[#allocation6 + $0x1f4] ss:$8 sps:$4 sm:$0xff]  }
  0x8b   :  { %1323 = vmatpush3.bf16.msra.mxu1 %v1545_v7  ;;  %v1559_v7 = vld [vmem:[#allocation9 + $0x18] sm:$0xff]  }
  0x8c   :  { %670 = vmatpush1.bf16.msra.mxu0 %v1457_v38  ;;  %1324 = vmatprep.subr.bf16.mxu1 %v1546_v8  ;;  %v1550_v38 = vld [vmem:[#allocation8 + $0x68] sm:$0xff]   ;;  %v1560_v8 = vld [vmem:[#allocation9 + $0x20] sm:$0xff]  }
  0x8d   :  { %671 = vmatprep.subr.bf16.mxu0 %v1458_v39  ;;  %v1551_v39 = vld [vmem:[#allocation8 + $0x28] sm:$0xff]  }
  0x8f   :  { %1325 = vmatpush3.bf16.msra.mxu1 %v1547_v11  ;;  %v1563_v11 = vld [vmem:[#allocation9 + $0x38] sm:$0xff]  }
  0x90   :  { %672 = vmatpush1.bf16.msra.mxu0 %v1460_v42  ;;  %1326 = vmatprep.subr.bf16.mxu1 %v1548_v12  ;;  %v1554_v42 = vld [vmem:[#allocation8 + $0x78] sm:$0xff]  }
  0x91   :  { %673 = vmatprep.subr.bf16.mxu0 %v1461_v43  ;;  %v1555_v43 = vld [vmem:[#allocation8 + $0x38] sm:$0xff]  }
  0x93   :  { %1327 = vmatpush3.bf16.msra.mxu1 %v1549_v15 }
  0x94   :  { %674 = vmatpush1.bf16.msra.mxu0 %v1463_v49  ;;  %1328 = vmatprep.subr.bf16.mxu1 %v1550_v38  ;;  %v217_v49 = vlaneseq }
  0x95   :  { %675 = vmatprep.subr.bf16.mxu0 %v1464_v51 }
  0x96   :  { %v218_v50 = vshrl.u32 %v217_v49, 7 }
  0x97   :  { %1329 = vmatpush3.bf16.msra.mxu1 %v1551_v39 }
  0x98   :  { %676 = vmatpush1.bf16.msra.mxu0 %v1466_v54  ;;  %1330 = vmatprep.subr.bf16.mxu1 %v1552_v40  ;;  %v219_v51 = vsub.s32 0, %v218_v50  ;;  %v223_v53 = vsub.s32 1, %v218_v50 }
  0x99   :  { %686 = vmatprep.subr.bf16.mxu0 %v1469_v55 }
  0x9a   :  { %v220_v54 = vrot.slane %v215_v52, %v219_v51  ;;  %v224_v55 = vrot.slane %v215_v52, %v223_v53 }
  0x9b   :  { %678 = vmatmul.mubr.bf16.vlgmr.msra.gmra.mrb[0].mxu0 %v1573_v58  ;;  %1331 = vmatpush3.bf16.msra.mxu1 %v1553_v41 }
  0x9c   :  { %687 = vmatpush1.bf16.msra.mxu0 %v1467_v56  ;;  %718 = vmatprep.mubr.bf16.mxu0 %v1574_v61 }
  0x9d   :  { %688 = vmatprep.subr.bf16.mxu0 %v1472_v59  ;;  %1332 = vmatprep.subr.bf16.mxu1 %v1554_v42 }
  0x9f   :  { %1333 = vmatpush3.bf16.msra.mxu1 %v1555_v43 }
  0xa0   :  { %689 = vmatpush1.bf16.msra.mxu0 %v1470_v1  ;;  %1358 = vmatprep.subr.bf16.mxu1 %v1726_v44 }
  0xa1   :  { %690 = vmatprep.subr.bf16.mxu0 %v1475_v2 }
  0xa4   :  { %691 = vmatpush1.bf16.msra.mxu0 %v1473_v5  ;;  %v1557_v5 = vld [vmem:[#allocation9 + $0x8] sm:$0xff]  }
  0xa5   :  { %692 = vmatprep.subr.bf16.mxu0 %v1478_v6  ;;  %v1558_v6 = vld [vmem:[#allocation9 + $0x10] sm:$0xff]  }
  0xa8   :  { %693 = vmatpush1.bf16.msra.mxu0 %v1476_v9  ;;  %v1561_v9 = vld [vmem:[#allocation9 + $0x28] sm:$0xff]  }
  0xa9   :  { %694 = vmatprep.subr.bf16.mxu0 %v1481_v10  ;;  %v1562_v10 = vld [vmem:[#allocation9 + $0x30] sm:$0xff]  }
  0xac   :  { %695 = vmatpush1.bf16.msra.mxu0 %v1479_v13  ;;  %v1280_v13 = vld [vmem:[%s1904_s4] ss:$0 sm:$0xff] }
  0xad   :  { %696 = vmatprep.subr.bf16.mxu0 %v1484_v14 }
  0xb0   :  { %697 = vmatpush1.bf16.msra.mxu0 %v1482_v16 }
  0xb1   :  { %698 = vmatprep.subr.bf16.mxu0 %v1487_v17 }
  0xb4   :  { %699 = vmatpush1.bf16.msra.mxu0 %v1485_v18 }
  0xb5   :  { %700 = vmatprep.subr.bf16.mxu0 %v1490_v19 }
  0xb8   :  { %701 = vmatpush1.bf16.msra.mxu0 %v1488_v20  ;;  %v1564_v20 = vld [vmem:[#allocation11] sm:$0xff]  }
  0xb9   :  { %702 = vmatprep.subr.bf16.mxu0 %v1495_v21 }
  0xbc   :  { %703 = vmatpush1.bf16.msra.mxu0 %v1493_v22  ;;  %v1565_v22 = vld [vmem:[#allocation11 + $0x8] sm:$0xff]  }
  0xbd   :  { %704 = vmatprep.subr.bf16.mxu0 %v1501_v23  ;;  %v1566_v23 = vld [vmem:[#allocation11 + $0x10] sm:$0xff]  }
  0xc0   :  { %705 = vmatpush1.bf16.msra.mxu0 %v1499_v24  ;;  %v1567_v24 = vld [vmem:[#allocation11 + $0x18] sm:$0xff]  }
  0xc1   :  { %706 = vmatprep.subr.bf16.mxu0 %v1507_v25  ;;  %v1568_v25 = vld [vmem:[#allocation11 + $0x20] sm:$0xff]  }
  0xc4   :  { %707 = vmatpush1.bf16.msra.mxu0 %v1505_v26  ;;  %v1569_v26 = vld [vmem:[#allocation11 + $0x28] sm:$0xff]  }
  0xc5   :  { %708 = vmatprep.subr.bf16.mxu0 %v1513_v27  ;;  %v1570_v27 = vld [vmem:[#allocation11 + $0x30] sm:$0xff]  }
  0xc8   :  { %709 = vmatpush1.bf16.msra.mxu0 %v1511_v28  ;;  %v1571_v28 = vld [vmem:[#allocation11 + $0x38] sm:$0xff]  }
  0xc9   :  { %710 = vmatprep.subr.bf16.mxu0 %v1519_v29  ;;  %v1297_v29 = vld [vmem:[%s1906_s6] ss:$0 sm:$0xff]  ;;  %s1686_s6 = scalar_lea.vmem %s1182_s12, 128 }
  0xca   :  { %p1687_p12 = scmp.ne.s32.totalorder %s1182_s12, %s1686_s6  ;;  %p1692_p0 = scmp.lt.s32.totalorder %s1686_s6, %s1686_s6 }
  0xcc   :  { %711 = vmatpush1.bf16.msra.mxu0 %v1517_v30  ;;  %p1693_p1 = por %p1692_p0, %p1691_p13 }
  0xcd   :  { %712 = vmatprep.subr.bf16.mxu0 %v1525_v31 }
  0xce   :  { %p1694_p2 = pnand %p1693_p1, %p1687_p12 }
  0xd0   :  { %713 = vmatpush1.bf16.msra.mxu0 %v1523_v32 }
  0xd1   :  { %714 = vmatprep.subr.bf16.mxu0 %v1531_v33 }
  0xd4   :  { %715 = vmatpush1.bf16.msra.mxu0 %v1529_v34 }
  0xd5   :  { %716 = vmatprep.subr.bf16.mxu0 %v1537_v35 }
  0xd8   :  { %717 = vmatpush1.bf16.msra.mxu0 %v1535_v36 }
  0xdb   :  { %719 = vmatmul.mubr.bf16.vlgmr.msra.gmra.mrb[0].mxu0 %v1575_v37  ;;  %v1306_v37 = vld [vmem:[%s1908_s8] ss:$0 sm:$0xff] }
 0x155   :  { %v761_v45 = vpop.f32.mrb[0].mxu1 }
 0x156   :  { %v763_v46 = vpop.f32.mrb[1].mxu1 }
 0x157   :  { %v765_v47 = vpop.f32.mrb[2].mxu1 }
 0x158   :  { %v766_v48 = vpop.f32.mrb[3].mxu1 }
 0x1ae   :  { %v720_v56 = vpop.f32.mrb[0].mxu0 }
 0x1af   :  { %v1398_v57 = vadd.f32 %v720_v56, %v220_v54  ;;  %v722_v58 = vpop.f32.mrb[1].mxu0 }
 0x1b0   :  { %v1400_v59 = vadd.f32 %v722_v58, %v224_v55  ;;  %v724_v60 = vpop.f32.mrb[2].mxu0 }
 0x1b1   :  { %v1399_v61 = vadd.f32 %v1398_v57, %v761_v45  ;;  %v725_v62 = vpop.f32.mrb[3].mxu0 }
 0x1b2   :  { %v1401_v63 = vadd.f32 %v1400_v59, %v763_v46 }
 0x1b3   :  { %v768_v1 = vmax.f32 %v1399_v61, 0.0 }
 0x1b4   :  { %v769_v0 = vmax.f32 %v1401_v63, 0.0 }
 0x1b5   :  { %v770_v4 = vpack.c.bf16 %v768_v1, %v768_v1 }
 0x1b6   :  { %v771_v2 = vpack.c.bf16 %v769_v0, %v769_v0 }
 0x1b8   :  { %939 = vmatprep.mubr.bf16.mxu1 %v771_v2 }
 0x1b9   :  { %940 = vmatmul.mubr.bf16.vlgmr.msra.gmra.mrb[4].mxu1 %v770_v4 }
 0x1ba   :  { %1359 = vmatpush3.bf16.msra.mxu1 %v1556_v3  ;;  %1374 = vmatprep.mubr.msk.bf16.mxu1 %vm1727_vm2, %v1726_v44 }
 0x1bb   :  { %1360 = vmatprep.subr.bf16.mxu1 %v1726_v44 }
 0x1be   :  { %1361 = vmatpush3.bf16.msra.mxu1 %v1557_v5 }
 0x1bf   :  { %1362 = vmatprep.subr.bf16.mxu1 %v1726_v44 }
 0x1c2   :  { %1363 = vmatpush3.bf16.msra.mxu1 %v1558_v6 }
 0x1c3   :  { %1364 = vmatprep.subr.bf16.mxu1 %v1726_v44 }
 0x1c6   :  { %1365 = vmatpush3.bf16.msra.mxu1 %v1559_v7 }
 0x1c7   :  { %1366 = vmatprep.subr.bf16.mxu1 %v1726_v44 }
 0x1ca   :  { %1367 = vmatpush3.bf16.msra.mxu1 %v1560_v8 }
 0x1cb   :  { %1368 = vmatprep.subr.bf16.mxu1 %v1726_v44 }
 0x1ce   :  { %1369 = vmatpush3.bf16.msra.mxu1 %v1561_v9 }
 0x1cf   :  { %1370 = vmatprep.subr.bf16.mxu1 %v1726_v44 }
 0x1d2   :  { %1371 = vmatpush3.bf16.msra.mxu1 %v1562_v10 }
 0x1d3   :  { %1372 = vmatprep.subr.bf16.mxu1 %v1726_v44 }
 0x1d6   :  { %1373 = vmatpush3.bf16.msra.mxu1 %v1563_v11 }
 0x1d7   :  { %1378 = vmatprep.subr.bf16.mxu1 %v1726_v44 }
 0x28c   :  { %v1334_v12 = vpop.f32.mrb[4].mxu1 }
 0x28d   :  { %v1335_v14 = vpop.f32.mrb[5].mxu1 }
 0x28e   :  { %v1336_v15 = vadd.f32 %v1335_v14, %v1334_v12  ;;  %v1337_v16 = vpop.f32.mrb[6].mxu1 }
 0x28f   :  { %v1338_v17 = vpop.f32.mrb[7].mxu1 }
 0x290   :  { %v942_v18 = vadd.f32 %v1336_v15, %v1280_v13 }
 0x292   :  { %v947_v19 = vmax.f32 %v942_v18, 0.0 }
 0x294   :  { %v948_v21 = vpack.c.bf16 %v947_v19, %v947_v19 }
 0x296   :  { %1375 = vmatmul.mubr.bf16.vlgmr.msra.gmra.mrb[8].mxu1 %v948_v21 }
 0x297   :  { %1379 = vmatpush3.bf16.msra.mxu1 %v1564_v20  ;;  %1394 = vmatprep.mubr.msk.bf16.mxu1 %vm1727_vm2, %v1726_v44 }
 0x298   :  { %1380 = vmatprep.subr.bf16.mxu1 %v1726_v44 }
 0x29b   :  { %1381 = vmatpush3.bf16.msra.mxu1 %v1565_v22 }
 0x29c   :  { %1382 = vmatprep.subr.bf16.mxu1 %v1726_v44 }
 0x29f   :  { %1383 = vmatpush3.bf16.msra.mxu1 %v1566_v23 }
 0x2a0   :  { %1384 = vmatprep.subr.bf16.mxu1 %v1726_v44 }
 0x2a3   :  { %1385 = vmatpush3.bf16.msra.mxu1 %v1567_v24 }
 0x2a4   :  { %1386 = vmatprep.subr.bf16.mxu1 %v1726_v44 }
 0x2a7   :  { %1387 = vmatpush3.bf16.msra.mxu1 %v1568_v25 }
 0x2a8   :  { %1388 = vmatprep.subr.bf16.mxu1 %v1726_v44 }
 0x2ab   :  { %1389 = vmatpush3.bf16.msra.mxu1 %v1569_v26 }
 0x2ac   :  { %1390 = vmatprep.subr.bf16.mxu1 %v1726_v44 }
 0x2af   :  { %1391 = vmatpush3.bf16.msra.mxu1 %v1570_v27 }
 0x2b0   :  { %1392 = vmatprep.subr.bf16.mxu1 %v1726_v44 }
 0x2b3   :  { %1393 = vmatpush3.bf16.msra.mxu1 %v1571_v28 }
 0x369   :  { %v1054_v30 = vpop.f32.mrb[8].mxu1 }
 0x36a   :  { %v1055_v31 = vadd.f32 %v1297_v29, %v1054_v30  ;;  %v1376_v32 = vpop.f32.mrb[9].mxu1 }
 0x36b   :  { %v1057_v33 = vpop.f32.mrb[10].mxu1 }
 0x36c   :  { %v1060_v34 = vmax.f32 %v1055_v31, 0.0  ;;  %v1377_v35 = vpop.f32.mrb[11].mxu1 }
 0x36e   :  { %v1061_v36 = vpack.c.bf16 %v1060_v34, %v1060_v34 }
 0x370   :  { %1395 = vmatmul.mubr.bf16.vlgmr.msra.gmra.mrb[12].mxu1 %v1061_v36 }
 0x443   :  { %v1167_v38 = vpop.f32.mrb[12].mxu1 }
 0x444   :  { %v1168_v39 = vadd.f32 %v1306_v37, %v1167_v38  ;;  %v1396_v40 = vpop.f32.mrb[13].mxu1 }
 0x445   :  { %v1170_v41 = vpop.f32.mrb[14].mxu1 }
 0x446   :  { %v1397_v42 = vpop.f32.mrb[15].mxu1  ;;  %1174 = vst.msk [vmem:[#allocation12] sm:$0xff] %vm1173_vm3, %v1168_v39 }
 0x447   :  { %1697 = shalt.err (!%p1694_p2)
}
 0x448   :  { %s1698_s8 = scalar_lea.hbm %s1909_s9, 128 }
 0x449   :  { %p1699_p3 = scmp.ne.s32.totalorder %s1909_s9, %s1698_s8  ;;  %p1702_p4 = scmp.lt.u32.totalorder %s1698_s8, %s1909_s9 }
 0x44b   :  { %p1704_p5 = pnand %p1702_p4, %p1699_p3 }
 0x44d   :  { %1707 = shalt.err (!%p1704_p5)
}
 0x44e   :  { %1184 = dma.vmem_to_hbm [thread:$0]  %s1182_s12, 128, %s1909_s9, [#allocation5]  }
 0x44f   :  { %1714 = dma.done.wait [#allocation5], 128  }
 0x450   :  { %1715 = vsyncadd [#allocation5], 4294967168 }
 0x451   :  { %1188 = vsyncpa [#allocation4], 1 }
 0x452   :  { %1189 = vsyncpa [#allocation7], 1 }
 0x453   :  { %1190 = vsyncpa [#allocation10], 1 }
 0x454   :  { %1191 = vsyncpa [#allocation5], 1 }

</bundles_post_ra>
